<compile_context>
chip_gen: v7x
topology: tpu7x:2x2x1
jax: 0.10.0
libtpu: 0.0.40
codegen_flags: <defaults>
</compile_context>

<pallas_src>
import functools

import jax
import jax.numpy as jnp
from jax.experimental import pallas as pl
from jax.experimental.pallas import tpu as pltpu


# --------------------------------------------------------------------------
# Kernel 1: once-per-sequence encoder projection (hoisted out of the step).
#   ek[s*B + b, :] = encoder_outputs[s, b, :] @ W_enc^T + bias
# --------------------------------------------------------------------------
def encoder_proj_kernel(eo_ref, we_ref, b_ref, out_ref):
    # eo_ref : [S*B, De2]   (flattened seq-major encoder outputs)
    # we_ref : [De2, Dd]    (W_enc already transposed in the wrapper)
    # b_ref  : [1, Dd]      (attn bias, folded here so the step kernel skips it)
    # out_ref: [S*B, Dd]
    out_ref[...] = (
        jnp.dot(eo_ref[...], we_ref[...], preferred_element_type=jnp.float32)
        + b_ref[...]
    ).astype(out_ref.dtype)


# --------------------------------------------------------------------------
# Kernel 2: per-decode-step attention (seq-major enc_proj, no host transpose).
#   energy = tanh(h @ W_hid^T + ek)          (bias already inside ek)
#   scores = sum(energy * v, axis=-1)        (VPU mul + lane reduce, no MXU)
#   out    = softmax(scores.T, axis=S)       (tiny [S,B]->[B,S] XLU transpose)
# --------------------------------------------------------------------------
def attention_step_kernel(h_ref, ek_ref, whv_ref, out_ref):
    # h_ref  : [B, Dd]       decoder hidden
    # ek_ref : [S, B, Dd]    precomputed encoder projection (+ bias), seq-major
    # whv_ref: [Dd+1, Dd]    rows [0:Dd] = W_hid^T, row [Dd] = v
    # out_ref: [B, S]
    Dd = h_ref.shape[1]

    whv = whv_ref[...]                      # single tiny VMEM load
    wh = whv[:Dd, :]                        # [Dd, Dd]  (already transposed)
    v = whv[Dd:Dd + 1, :]                   # [1, Dd]

    h = h_ref[...].astype(jnp.float32)      # [B, Dd]

    # hidden contribution (same for every src position): [B, Dd]
    hb = jnp.dot(h, wh, preferred_element_type=jnp.float32)

    # energy = tanh(hidden_part + encoder_part(+bias)) : [S, B, Dd]
    energy = jnp.tanh(ek_ref[...] + hb[None, :, :])

    # v-projection as elementwise multiply + cross-lane reduce -> [S, B]
    scores_sb = jnp.sum(energy * v[None, :, :], axis=-1)

    # [S, B] -> [B, S]: tiny on-chip XLU transpose (replaces the old host-side
    # XLA transpose of the full [S, B, Dd] intermediate between the kernels).
    scores = scores_sb.T

    # softmax over src_len axis (axis=1); divide -> EUP approx reciprocal
    m = jnp.max(scores, axis=1, keepdims=True)
    e = jnp.exp(scores - m)
    denom = jnp.sum(e, axis=1, keepdims=True)
    out_ref[...] = (e * pl.reciprocal(denom, approx=True)).astype(out_ref.dtype)


# --------------------------------------------------------------------------
# Wrappers
# --------------------------------------------------------------------------
def prepare_attention_params(w_attn, b_attn, w_v, dec_hidden_dim):
    """Step-invariant parameter prep (transposes / packing) — done once."""
    Dd = dec_hidden_dim
    w_hid_t = jnp.transpose(w_attn[:, :Dd])      # [Dd, Dd]
    w_enc_t = jnp.transpose(w_attn[:, Dd:])      # [De2, Dd]
    b_row = b_attn.reshape(1, Dd)                # [1, Dd]
    v_row = w_v.reshape(1, Dd)                   # [1, Dd]
    whv = jnp.concatenate([w_hid_t, v_row], axis=0)   # [Dd+1, Dd]
    return whv, w_enc_t, b_row


def precompute_encoder_projection(encoder_outputs, w_enc_t, b_row):
    """Once per sequence: [S, B, De2] -> [S, B, Dd] encoder projection.

    The result stays in seq-major layout: the reshape below is contiguous
    (metadata only), so no device transpose/copy happens between kernels.
    """
    S, B, De2 = encoder_outputs.shape
    Dd = w_enc_t.shape[1]
    eo2d = encoder_outputs.reshape(S * B, De2)   # free reshape (contiguous)
    ek2d = pl.pallas_call(
        encoder_proj_kernel,
        out_shape=jax.ShapeDtypeStruct((S * B, Dd), jnp.float32),
        in_specs=[
            pl.BlockSpec(memory_space=pltpu.VMEM),   # eo [S*B, De2]
            pl.BlockSpec(memory_space=pltpu.VMEM),   # W_enc^T
            pl.BlockSpec(memory_space=pltpu.VMEM),   # bias row
        ],
        out_specs=pl.BlockSpec(memory_space=pltpu.VMEM),
    )(eo2d, w_enc_t, b_row)
    return ek2d.reshape(S, B, Dd)                # free reshape, seq-major kept


def attention_step(hidden, enc_proj, whv):
    """Per-decode-step Pallas call: 3 VMEM inputs, one [B, S] output."""
    S, B, _ = enc_proj.shape
    return pl.pallas_call(
        attention_step_kernel,
        out_shape=jax.ShapeDtypeStruct((B, S), jnp.float32),
        in_specs=[
            pl.BlockSpec(memory_space=pltpu.VMEM),   # hidden [B, Dd]
            pl.BlockSpec(memory_space=pltpu.VMEM),   # enc_proj [S, B, Dd]
            pl.BlockSpec(memory_space=pltpu.VMEM),   # packed W_hid^T + v
        ],
        out_specs=pl.BlockSpec(memory_space=pltpu.VMEM),
    )(hidden, enc_proj, whv)


@functools.partial(jax.jit, static_argnums=(5,))
def attention_forward(hidden, encoder_outputs, w_attn, b_attn, w_v,
                      dec_hidden_dim):
    """Full module forward: hidden [B, Dd], encoder_outputs [S, B, De2]."""
    whv, w_enc_t, b_row = prepare_attention_params(w_attn, b_attn, w_v,
                                                   dec_hidden_dim)
    # In a real decoder loop, enc_proj (and whv) would be computed once and
    # reused for every call to attention_step.
    enc_proj = precompute_encoder_projection(encoder_outputs, w_enc_t, b_row)
    return attention_step(hidden, enc_proj, whv)


def reference_forward(hidden, encoder_outputs, w_attn, b_attn, w_v):
    """Pure-JAX reference mirroring the PyTorch forward exactly."""
    S, B, _ = encoder_outputs.shape
    h_rep = jnp.repeat(hidden[:, None, :], S, axis=1)          # [B, S, Dd]
    eo = jnp.transpose(encoder_outputs, (1, 0, 2))             # [B, S, De2]
    cat = jnp.concatenate([h_rep, eo], axis=2)                 # [B, S, Dd+De2]
    energy = jnp.tanh(cat @ w_attn.T + b_attn)                 # [B, S, Dd]
    attention = (energy @ w_v.T)[..., 0]                       # [B, S]
    return jax.nn.softmax(attention, axis=1)


if __name__ == "__main__":
    # Small shapes consistent with the module:
    #   enc_hidden_dim=32, dec_hidden_dim=32, bidirectional=True
    #   -> encoder feature dim De2 = 2*32 = 64, attn input dim = 64 + 32 = 96
    enc_hidden_dim = 32
    dec_hidden_dim = 32
    B, S = 2, 8
    De2 = 2 * enc_hidden_dim

    key = jax.random.PRNGKey(0)
    k_h, k_eo, k_wa, k_ba, k_wv = jax.random.split(key, 5)

    hidden = jax.random.normal(k_h, (B, dec_hidden_dim), dtype=jnp.float32)
    encoder_outputs = jax.random.normal(k_eo, (S, B, De2), dtype=jnp.float32)

    # Deterministic parameter init (uniform, roughly PyTorch Linear scale).
    in_dim = De2 + dec_hidden_dim
    bound_a = 1.0 / jnp.sqrt(in_dim)
    bound_v = 1.0 / jnp.sqrt(dec_hidden_dim)
    w_attn = jax.random.uniform(k_wa, (dec_hidden_dim, in_dim),
                                minval=-bound_a, maxval=bound_a,
                                dtype=jnp.float32)
    b_attn = jax.random.uniform(k_ba, (dec_hidden_dim,),
                                minval=-bound_a, maxval=bound_a,
                                dtype=jnp.float32)
    w_v = jax.random.uniform(k_wv, (1, dec_hidden_dim),
                             minval=-bound_v, maxval=bound_v,
                             dtype=jnp.float32)

    out = attention_forward(hidden, encoder_outputs, w_attn, b_attn, w_v,
                            dec_hidden_dim)
    out = jax.block_until_ready(out)

    ref = reference_forward(hidden, encoder_outputs, w_attn, b_attn, w_v)
    assert out.shape == (B, S)
    # Tolerance accounts for the EUP approximate reciprocal in the softmax
    # normalization (~1e-3-class error is acceptable here).
    assert jnp.allclose(out, ref, atol=5e-3, rtol=5e-3), "mismatch vs reference"
    assert jnp.allclose(jnp.sum(out, axis=1), 1.0, atol=5e-3)

    print("KERNEL_OK")
</pallas_src>

<mosaic_0001>
module attributes {stable_mosaic.version = 11 : i64} {
  func.func @encoder_proj_kernel(%arg0: memref<16x64xf32, #tpu.memory_space<vmem>>, %arg1: memref<64x32xf32, #tpu.memory_space<vmem>>, %arg2: memref<1x32xf32, #tpu.memory_space<vmem>>, %arg3: memref<16x32xf32, #tpu.memory_space<vmem>>) attributes {dimension_semantics = [], scalar_prefetch = 0 : i64, scratch_operands = 0 : i64, tpu.core_type = #tpu.core_type<tc>} {
    %c0 = arith.constant 0 : index
    %c0_0 = arith.constant 0 : index
    %0 = vector.load %arg0[%c0, %c0_0] : memref<16x64xf32, #tpu.memory_space<vmem>>, vector<16x64xf32>
    %c0_1 = arith.constant 0 : index
    %c0_2 = arith.constant 0 : index
    %1 = vector.load %arg1[%c0_1, %c0_2] : memref<64x32xf32, #tpu.memory_space<vmem>>, vector<64x32xf32>
    %cst = arith.constant dense<0.000000e+00> : vector<16x32xf32>
    %2 = tpu.matmul %0, %1, %cst {dimension_numbers = #tpu.dot_dimension_numbers<[1], [0], [0], [1], [0, 0, 1, 1], [], []>} : vector<16x64xf32>, vector<64x32xf32>, vector<16x32xf32> -> vector<16x32xf32>
    %c0_3 = arith.constant 0 : index
    %c0_4 = arith.constant 0 : index
    %3 = vector.load %arg2[%c0_3, %c0_4] : memref<1x32xf32, #tpu.memory_space<vmem>>, vector<1x32xf32>
    %4 = vector.broadcast %3 : vector<1x32xf32> to vector<16x32xf32>
    %5 = arith.addf %2, %4 : vector<16x32xf32>
    %c0_5 = arith.constant 0 : index
    %c0_6 = arith.constant 0 : index
    %6 = vector.load %arg3[%c0_5, %c0_6] : memref<16x32xf32, #tpu.memory_space<vmem>>, vector<16x32xf32>
    tpu.vector_store %arg3[%c0_5, %c0_6], %5 {strides = array<i32>} : memref<16x32xf32, #tpu.memory_space<vmem>>, vector<16x32xf32>,
    return
  }
}

module attributes {stable_mosaic.version = 11 : i64} {
  func.func @attention_step_kernel(%arg0: memref<2x32xf32, #tpu.memory_space<vmem>>, %arg1: memref<8x2x32xf32, #tpu.memory_space<vmem>>, %arg2: memref<33x32xf32, #tpu.memory_space<vmem>>, %arg3: memref<2x8xf32, #tpu.memory_space<vmem>>) attributes {dimension_semantics = [], scalar_prefetch = 0 : i64, scratch_operands = 0 : i64, tpu.core_type = #tpu.core_type<tc>} {
    %c0 = arith.constant 0 : index
    %c0_0 = arith.constant 0 : index
    %0 = vector.load %arg2[%c0, %c0_0] : memref<33x32xf32, #tpu.memory_space<vmem>>, vector<33x32xf32>
    %1 = vector.extract_strided_slice %0 {offsets = [0, 0], sizes = [32, 32], strides = [1, 1]} : vector<33x32xf32> to vector<32x32xf32>
    %2 = vector.extract_strided_slice %0 {offsets = [32, 0], sizes = [1, 32], strides = [1, 1]} : vector<33x32xf32> to vector<1x32xf32>
    %c0_1 = arith.constant 0 : index
    %c0_2 = arith.constant 0 : index
    %3 = vector.load %arg0[%c0_1, %c0_2] : memref<2x32xf32, #tpu.memory_space<vmem>>, vector<2x32xf32>
    %cst = arith.constant dense<0.000000e+00> : vector<2x32xf32>
    %4 = tpu.matmul %3, %1, %cst {dimension_numbers = #tpu.dot_dimension_numbers<[1], [0], [0], [1], [0, 0, 1, 1], [], []>} : vector<2x32xf32>, vector<32x32xf32>, vector<2x32xf32> -> vector<2x32xf32>
    %c0_3 = arith.constant 0 : index
    %c0_4 = arith.constant 0 : index
    %c0_5 = arith.constant 0 : index
    %5 = vector.load %arg1[%c0_3, %c0_4, %c0_5] : memref<8x2x32xf32, #tpu.memory_space<vmem>>, vector<8x2x32xf32>
    %6 = vector.shape_cast %4 : vector<2x32xf32> to vector<1x2x32xf32>
    %7 = vector.broadcast %6 : vector<1x2x32xf32> to vector<8x2x32xf32>
    %8 = arith.addf %5, %7 : vector<8x2x32xf32>
    %9 = math.tanh %8 : vector<8x2x32xf32>
    %10 = vector.shape_cast %2 : vector<1x32xf32> to vector<1x1x32xf32>
    %11 = vector.broadcast %10 : vector<1x1x32xf32> to vector<8x2x32xf32>
    %12 = arith.mulf %9, %11 : vector<8x2x32xf32>
    %cst_6 = arith.constant dense<0.000000e+00> : vector<8x2xf32>
    %13 = vector.multi_reduction <add>, %12, %cst_6 [2] : vector<8x2x32xf32> to vector<8x2xf32>
    %14 = tpu.transpose %13, [1, 0] : vector<8x2xf32> -> vector<2x8xf32>
    %cst_7 = arith.constant dense<0xFF800000> : vector<2xf32>
    %15 = vector.multi_reduction <maximumf>, %14, %cst_7 [1] : vector<2x8xf32> to vector<2xf32>
    %16 = vector.shape_cast %15 : vector<2xf32> to vector<2x1xf32>
    %17 = vector.broadcast %16 : vector<2x1xf32> to vector<2x8xf32>
    %18 = arith.subf %14, %17 : vector<2x8xf32>
    %19 = math.exp %18 : vector<2x8xf32>
    %cst_8 = arith.constant dense<0.000000e+00> : vector<2xf32>
    %20 = vector.multi_reduction <add>, %19, %cst_8 [1] : vector<2x8xf32> to vector<2xf32>
    %21 = vector.shape_cast %20 : vector<2xf32> to vector<2x1xf32>
    %22 = tpu.reciprocal %21 {approx = true} : vector<2x1xf32> -> vector<2x1xf32>
    %23 = vector.broadcast %22 : vector<2x1xf32> to vector<2x8xf32>
    %24 = arith.mulf %19, %23 : vector<2x8xf32>
    %c0_9 = arith.constant 0 : index
    %c0_10 = arith.constant 0 : index
    %25 = vector.load %arg3[%c0_9, %c0_10] : memref<2x8xf32, #tpu.memory_space<vmem>>, vector<2x8xf32>
    tpu.vector_store %arg3[%c0_9, %c0_10], %24 {strides = array<i32>} : memref<2x8xf32, #tpu.memory_space<vmem>>, vector<2x8xf32>,
    return
  }
}

</mosaic_0001>

<bundles_post_ra>
// kernel: attention_forward.2
= control target key start
LH: loop header
LB: loop body
LE: loop exit
PB: predicated region body
PF: predicated region fallthrough
CT: control target
= control target key end

     0   :  { %vm31_vm0 = vcmask 523264   ;;  %vm113_vm1 = vcmask 261120   ;;  %s229_s1 = inlined_call_operand.vmem [shape: f32[64,32], index: 1, kind: input, shape index: {}]   ;;  %s230_s0 = inlined_call_operand.vmem [shape: f32[16,64], index: 0, kind: input, shape index: {}]   ;;  %s231_s2 = inlined_call_operand.vmem [shape: f32[1,32], index: 2, kind: input, shape index: {}]   ;;  %s232_s3 = inlined_call_operand.vmem [shape: f32[16,32], index: 3, kind: output, shape index: {}]  }
   0x1   :  { %v16_v0 = vld [vmem:[%s229_s1] sm:$0xff]  ;;  %v17_v1 = vld [vmem:[%s229_s1 + $0x8] sm:$0xff]  ;;  %v18_v2 = vld [vmem:[%s229_s1 + $0x10] sm:$0xff] }
   0x2   :  { %v152_v3 = vpack.c.bf16 %v17_v1, %v16_v0  ;;  %v19_v4 = vld [vmem:[%s229_s1 + $0x18] sm:$0xff]  ;;  %v20_v6 = vld [vmem:[%s229_s1 + $0x20] sm:$0xff]  ;;  %v21_v7 = vld [vmem:[%s229_s1 + $0x28] sm:$0xff] }
   0x3   :  { %v156_v5 = vpack.c.bf16 %v19_v4, %v18_v2  ;;  %v14_v8 = vld [vmem:[%s230_s0] sm:$0xff]  ;;  %v160_v9 = vpack.c.bf16 %v21_v7, %v20_v6  ;;  %v22_v10 = vld [vmem:[%s229_s1 + $0x30] sm:$0xff]  ;;  %v23_v11 = vld [vmem:[%s229_s1 + $0x38] sm:$0xff] }
   0x4   :  { %153 = vmatprep.subr.bf16.mxu0 %v152_v3  ;;  %149 = vmatprep.mubr.msk.f32.mxu0 %vm31_vm0, %v14_v8  ;;  %v164_v12 = vpack.c.bf16 %v23_v11, %v22_v10  ;;  %v15_v13 = vld [vmem:[%s230_s0 + $0x8] sm:$0xff]  ;;  %v120_v14 = vld [vmem:[%s231_s2] ss:$0 sm:$0xff] }
   0x5   :  { %155 = vmatpush3.bf16.msra.mxu0 %v152_v3 }
   0x6   :  { %157 = vmatprep.subr.bf16.mxu0 %v156_v5 }
   0x9   :  { %159 = vmatpush3.bf16.msra.mxu0 %v156_v5 }
   0xa   :  { %161 = vmatprep.subr.bf16.mxu0 %v160_v9 }
   0xd   :  { %163 = vmatpush3.bf16.msra.mxu0 %v160_v9 }
   0xe   :  { %165 = vmatprep.subr.bf16.mxu0 %v164_v12 }
  0x11   :  { %167 = vmatpush3.bf16.msra.mxu0 %v164_v12 }
  0x14   :  { %150 = vmatmul.mubr.msk.f32.vlgmr.msra.gmra.mrb[0].mxu0 %vm31_vm0, %v15_v13 }
  0xe7   :  { %v151_v15 = vpop.f32.mrb[0].mxu0 }
  0xe8   :  { %v110_v16 = vadd.f32 %v151_v15, %v120_v14  ;;  %v104_v17 = vpop.f32.mrb[1].mxu0 }
  0xe9   :  { %v105_v18 = vadd.f32 %v120_v14, %v104_v17 }
  0xea   :  { %115 = vst.msk [vmem:[%s232_s3 + $0x8] sm:$0xff] %vm113_vm1, %v110_v16 }
  0xeb   :  { %114 = vst.msk [vmem:[%s232_s3] sm:$0xff] %vm113_vm1, %v105_v18 }

// kernel: attention_forward.3
= control target key start
LH: loop header
LB: loop body
LE: loop exit
PB: predicated region body
PF: predicated region fallthrough
CT: control target
= control target key end

     0   :  { %v344_v3 = vmov 0.0|0.0   ;;  %vm345_vm0 = vmmov 0   ;;  %v346_v6 = vmov 0.0   ;;  %s433_s0 = inlined_call_operand.vmem [shape: f32[2,32], index: 0, kind: input, shape index: {}]   ;;  %s434_s1 = inlined_call_operand.vmem [shape: f32[8,2,32], index: 1, kind: input, shape index: {}]   ;;  %s435_s2 = inlined_call_operand.vmem [shape: f32[33,32], index: 2, kind: input, shape index: {}]   ;;  %s436_s3 = inlined_call_operand.hbm [shape: f32[2,8], index: 3, kind: output, shape index: {}]  }
   0x1   :  { %v15_v0 = vld [vmem:[%s435_s2] sm:$0xff]  ;;  %v16_v1 = vld [vmem:[%s435_s2 + $0x8] sm:$0xff]  ;;  %v17_v2 = vld [vmem:[%s435_s2 + $0x10] sm:$0xff]  ;;  %290 = vmatprep.subr.bf16.mxu0 %v344_v3  ;;  %287 = vmatprep.mubr.msk.f32.mxu0 %vm345_vm0, %v346_v6 }
   0x2   :  { %v291_v4 = vpack.c.bf16 %v16_v1, %v15_v0  ;;  %v18_v5 = vld [vmem:[%s435_s2 + $0x18] sm:$0xff] }
   0x3   :  { %8 = vsyncpa [#allocation3], 0  ;;  %v294_v7 = vpack.c.bf16 %v18_v5, %v17_v2  ;;  %v20_v8 = vld [vmem:[%s433_s0] sm:$0x3]  ;;  %vm21_vm1 = vcmask 261120   ;;  %vm131_vm2 = vcmask 254976   ;;  %v164_v52 = vlaneseq }
   0x4   :  { %292 = vmatpush3.bf16.msra.mxu0 %v291_v4  ;;  %v97_v9 = vld [vmem:[%s434_s1 + $0x4] sm:$0x3]  ;;  %v95_v10 = vld [vmem:[%s434_s1] sm:$0x3]  ;;  %v98_v11 = vld [vmem:[%s434_s1 + $0x6] sm:$0x3] }
   0x5   :  { %293 = vmatprep.subr.bf16.mxu0 %v344_v3  ;;  %v96_v12 = vld [vmem:[%s434_s1 + $0x2] sm:$0x3]  ;;  %v100_v14 = vld [vmem:[%s434_s1 + $0xa] sm:$0x3]  ;;  %v99_v19 = vld [vmem:[%s434_s1 + $0x8] sm:$0x3] }
   0x6   :  { %v102_v23 = vld [vmem:[%s434_s1 + $0xe] sm:$0x3]  ;;  %v101_v24 = vld [vmem:[%s434_s1 + $0xc] sm:$0x3]  ;;  %v273_v27 = vld [vmem:[%s435_s2 + $0x20] ss:$0 sm:$0xff] }
   0x7   :  { %v165_v53 = vand.u32 127, %v164_v52  ;;  %v167_v54 = vshrl.u32 %v164_v52, 7  ;;  %vm198_vm3 = vcmask 1041409   ;;  %vm200_vm4 = vcmask 1042434   ;;  %s347_s1 = smov [#allocation2]  }
   0x8   :  { %295 = vmatpush3.bf16.msra.mxu0 %v294_v7  ;;  %vm202_vm5 = vcmask 1043459   ;;  %vm204_vm6 = vcmask 1044484   ;;  %vm206_vm7 = vcmask 1045509   ;;  %vm208_vm8 = vcmask 1046534   ;;  %s264_s2 = sshll.u32 %s347_s1, 4  ;;  %s265_s2 = int_to_ptr.vmem [resolvable:$true] %s264_s2 }
   0x9   :  { %v168_v57 = vsub.s32 %v165_v53, %v167_v54  ;;  %vm210_vm9 = vcmask 1047559   ;;  %vm245_vm10 = vcmask 58368   ;;  %s320_s12 = scalar_lea.vmem %s265_s2, 32  ;;  %p325_p1 = scmp.lt.s32.totalorder %s265_s2, %s265_s2 }
   0xa   :  { %p321_p0 = scmp.ne.s32.totalorder %s265_s2, %s320_s12  ;;  %p326_p2 = scmp.lt.s32.totalorder %s320_s12, %s320_s12 }
   0xb   :  { %288 = vmatmul.mubr.msk.f32.vlgmr.msra.gmra.mrb[0].mxu0 %vm21_vm1, %v20_v8 }
   0xc   :  { %p327_p3 = por %p326_p2, %p325_p1 }
   0xe   :  { %p328_p4 = pnand %p327_p3, %p321_p0 }
  0xde   :  { %v91_v13 = vpop.f32.mrb[0].mxu0 }
  0xdf   :  { %v289_v15 = vpop.f32.mrb[1].mxu0  ;;  %v105_v16 = vadd.f32 %v97_v9, %v91_v13  ;;  %v103_v17 = vadd.f32 %v95_v10, %v91_v13  ;;  %v106_v18 = vadd.f32 %v98_v11, %v91_v13  ;;  %v104_v20 = vadd.f32 %v96_v12, %v91_v13 }
  0xe0   :  { %v108_v21 = vadd.f32 %v100_v14, %v91_v13  ;;  %v107_v22 = vadd.f32 %v99_v19, %v91_v13  ;;  %v110_v25 = vadd.f32 %v102_v23, %v91_v13  ;;  %v109_v26 = vadd.f32 %v101_v24, %v91_v13 }
  0xe1   :  { %300 = vtanh.f32 %v105_v16 }
  0xe2   :  { %302 = vtanh.f32 %v103_v17 }
  0xe3   :  { %304 = vtanh.f32 %v106_v18 }
  0xe4   :  { %306 = vtanh.f32 %v104_v20 }
  0xe5   :  { %308 = vtanh.f32 %v108_v21 }
  0xe6   :  { %310 = vtanh.f32 %v107_v22 }
  0xe7   :  { %312 = vtanh.f32 %v110_v25 }
  0xe8   :  { %314 = vtanh.f32 %v109_v26 }
  0xeb   :  { %v301_v28 = vpop.eup %300 }
  0xec   :  { %v303_v29 = vpop.eup %302  ;;  %v125_v30 = vmul.f32 %v301_v28, %v273_v27 }
  0xed   :  { %v305_v31 = vpop.eup %304  ;;  %v123_v32 = vmul.f32 %v303_v29, %v273_v27 }
  0xee   :  { %v307_v33 = vpop.eup %306  ;;  %v138_v34 = vsel %vm131_vm2, %v125_v30, 0.0  ;;  %v126_v35 = vmul.f32 %v305_v31, %v273_v27 }
  0xef   :  { %v309_v36 = vpop.eup %308  ;;  %139 = vadd.xlane.f32.xlu1 %v138_v34  ;;  %v132_v37 = vsel %vm131_vm2, %v123_v32, 0.0  ;;  %v124_v38 = vmul.f32 %v307_v33, %v273_v27 }
  0xf0   :  { %v311_v39 = vpop.eup %310  ;;  %133 = vadd.xlane.f32.xlu0 %v132_v37  ;;  %v141_v40 = vsel %vm131_vm2, %v126_v35, 0.0  ;;  %v128_v41 = vmul.f32 %v309_v36, %v273_v27 }
  0xf1   :  { %v313_v42 = vpop.eup %312  ;;  %v135_v43 = vsel %vm131_vm2, %v124_v38, 0.0  ;;  %v127_v44 = vmul.f32 %v311_v39, %v273_v27 }
  0xf2   :  { %v315_v45 = vpop.eup %314  ;;  %v147_v46 = vsel %vm131_vm2, %v128_v41, 0.0  ;;  %v130_v47 = vmul.f32 %v313_v42, %v273_v27 }
  0xf3   :  { %142 = vadd.xlane.f32.xlu1 %v141_v40  ;;  %v144_v48 = vsel %vm131_vm2, %v127_v44, 0.0  ;;  %v129_v49 = vmul.f32 %v315_v45, %v273_v27 }
  0xf4   :  { %136 = vadd.xlane.f32.xlu0 %v135_v43  ;;  %v153_v50 = vsel %vm131_vm2, %v130_v47, 0.0 }
  0xf5   :  { %v150_v51 = vsel %vm131_vm2, %v129_v49, 0.0 }
  0xf7   :  { %148 = vadd.xlane.f32.xlu1 %v147_v46 }
  0xf8   :  { %145 = vadd.xlane.f32.xlu0 %v144_v48 }
  0xfb   :  { %154 = vadd.xlane.f32.xlu1 %v153_v50 }
  0xfc   :  { %151 = vadd.xlane.f32.xlu0 %v150_v51 }
 0x17c   :  { %v140_v55 = vpop.xlane.xlu1 %139 }
 0x17d   :  { %v134_v56 = vpop.xlane.xlu0 %133  ;;  %v177_v62 = vrot.slane %v140_v55, %v168_v57 }
 0x17e   :  { %v169_v60 = vrot.slane %v134_v56, %v168_v57 }
 0x180   :  { %v143_v58 = vpop.xlane.xlu1 %142 }
 0x181   :  { %v137_v59 = vpop.xlane.xlu0 %136  ;;  %v181_v63 = vrot.slane %v143_v58, %v168_v57 }
 0x182   :  { %v173_v61 = vrot.slane %v137_v59, %v168_v57 }
 0x184   :  { %v199_v0 = vsel %vm198_vm3, %v173_v61, %v169_v60  ;;  %v149_v1 = vpop.xlane.xlu1 %148 }
 0x185   :  { %v201_v2 = vsel %vm200_vm4, %v177_v62, %v199_v0  ;;  %v146_v3 = vpop.xlane.xlu0 %145  ;;  %v189_v6 = vrot.slane %v149_v1, %v168_v57 }
 0x186   :  { %v203_v4 = vsel %vm202_vm5, %v181_v63, %v201_v2  ;;  %v185_v5 = vrot.slane %v146_v3, %v168_v57 }
 0x188   :  { %v205_v7 = vsel %vm204_vm6, %v185_v5, %v203_v4  ;;  %v155_v8 = vpop.xlane.xlu1 %154 }
 0x189   :  { %v197_v9 = vrot.slane %v155_v8, %v168_v57  ;;  %v152_v10 = vpop.xlane.xlu0 %151  ;;  %v207_v12 = vsel %vm206_vm7, %v189_v6, %v205_v7 }
 0x18a   :  { %v193_v11 = vrot.slane %v152_v10, %v168_v57 }
 0x18c   :  { %v209_v13 = vsel %vm208_vm8, %v193_v11, %v207_v12 }
 0x18d   :  { %v211_v14 = vsel %vm210_vm9, %v197_v9, %v209_v13 }
 0x18e   :  { %213 = vxpose.xlu0.b32.start.end [1/1] (short) (narrow) %v211_v14, 8 }
 0x20e   :  { %v229_v15 = vpop.trf.xlu0 }
 0x20f   :  { %v246_v16 = vsel %vm245_vm10, %v229_v15, -inf }
 0x210   :  { %247 = vmax.xlane.f32.xlu1 %v246_v16 }
 0x29d   :  { %v248_v17 = vpop.xlane.xlu1 %247 }
 0x29e   :  { %v249_v18 = vsub.f32 %v229_v15, %v248_v17 }
 0x2a0   :  { %v250_v19 = vmul.f32 1.442695, %v249_v18 }
 0x2a2   :  { %316 = vpow2.f32 %v250_v19 }
 0x2ac   :  { %v317_v20 = vpop.eup %316 }
 0x2ad   :  { %v252_v21 = vsel %vm245_vm10, %v317_v20, 0.0 }
 0x2ae   :  { %253 = vadd.xlane.f32.xlu1 %v252_v21 }
 0x33b   :  { %v254_v22 = vpop.xlane.xlu1 %253 }
 0x33c   :  { %318 = vrcp.f32 %v254_v22 }
 0x346   :  { %v319_v23 = vpop.eup %318 }
 0x347   :  { %v256_v24 = vmul.f32 %v319_v23, %v317_v20 }
 0x349   :  { %257 = vst.msk [vmem:[#allocation2] sm:$0x3] %vm245_vm10, %v256_v24 }
 0x34a   :  { %331 = shalt.err (!%p328_p4)
}
 0x34b   :  { %s332_s15 = scalar_lea.hbm %s436_s3, 32 }
 0x34c   :  { %p333_p5 = scmp.ne.s32.totalorder %s436_s3, %s332_s15  ;;  %p336_p6 = scmp.lt.u32.totalorder %s332_s15, %s436_s3 }
 0x34e   :  { %p338_p7 = pnand %p336_p6, %p333_p5 }
 0x350   :  { %341 = shalt.err (!%p338_p7)
}
 0x351   :  { %267 = dma.vmem_to_hbm [thread:$0]  %s265_s2, 32, %s436_s3, [#allocation3]  }
 0x352   :  { %342 = dma.done.wait [#allocation3], 32  }
 0x353   :  { %343 = vsyncadd [#allocation3], 4294967264 }
 0x354   :  { %271 = vsyncpa [#allocation3], 1 }

</bundles_post_ra>
